<compile_context>
chip_gen: v7x
topology: tpu7x:2x2x1
jax: 0.10.0
libtpu: 0.0.40
codegen_flags: <defaults>
</compile_context>

<pallas_src>
import jax
import jax.numpy as jnp
from jax.experimental import pallas as pl
from jax.experimental.pallas import tpu as pltpu


def _cdiv(a, b):
    return -(-a // b)


def _vmem_capacity_bytes():
    """Per-core VMEM capacity; conservative 64 MiB (v7x) fallback."""
    try:
        info = pltpu.get_tpu_info()
        cap = getattr(info, "vmem_capacity_bytes", None)
        if cap:
            return int(cap)
    except Exception:
        pass
    return 64 * 1024 * 1024


def _choose_tiles(B, Cin, Cout, T, in_bytes, out_bytes, vmem_budget, target_cols):
    """Pick (batch_block, time_tile, vmem_footprint).

    time_tile is a multiple of 128 (or the full time extent).  Together the
    two target `target_cols` lane columns of work per grid step, capped by the
    VMEM budget for the double-buffered x/out blocks plus the resident
    weight/bias buffers.
    """
    per_col = 2 * (Cin * in_bytes + Cout * out_bytes)        # x + out, double-buffered
    const_bytes = 2 * (Cin * Cout * in_bytes + Cout * 4)     # weight + bias buffers
    avail = max(vmem_budget - const_bytes, 128 * 1024)
    target_cols = int(max(128, min(target_cols, avail // per_col)))

    n_t = _cdiv(T, target_cols)                   # near-even split of the time axis
    tT = min(128 * _cdiv(_cdiv(T, n_t), 128), T)  # multiple of 128, or full T
    bB = 1
    if tT < target_cols:                          # short utterances: block batch rows
        bB = int(min(B, max(1, target_cols // tT)))
    footprint = bB * tT * per_col + const_bytes
    return int(bB), int(tT), int(footprint)


def _pointwise_conv1d_kernel(x_ref, w_ref, b_ref, o_ref):
    """One (batch-block, time-tile) grid step.

    x_ref: (bB, Cin, tT)     w_ref: (Cout, Cin)
    b_ref: (Cout, 1) f32     o_ref: (bB, Cout, tT)
    """
    w = w_ref[...]        # resident weight, loaded once per step
    bias = b_ref[...]     # (Cout, 1), lane-broadcast on add
    # Small static unroll over the batch rows in this block: each row is one
    # MXU matmul with f32 accumulation; bias added in f32; single cast on store.
    for bi in range(x_ref.shape[0]):
        y = jnp.dot(w, x_ref[bi], preferred_element_type=jnp.float32)
        o_ref[bi] = (y + bias).astype(o_ref.dtype)


def pointwise_conv1d(x, w, b=None, *, stride=1, padding=0,
                     compute_dtype=jnp.bfloat16, out_dtype=None,
                     block_cols=None):
    """Equivalent of PointwiseConv1d.forward (nn.Conv1d with kernel_size=1).

    x: (B, Cin, T);  w: (Cout, Cin) or PyTorch layout (Cout, Cin, 1);
    b: (Cout,) or None.  Inputs/weights are cast to `compute_dtype`
    (default bf16), accumulated in f32 on the MXU; `out_dtype` defaults to
    x.dtype.  `block_cols` overrides the per-step lane-column target
    (tuning / testing).
    """
    if w.ndim == 3:                       # PyTorch Conv1d weight (Cout, Cin, 1)
        w = w[:, :, 0]
    Cout, Cin_w = w.shape
    out_dtype = x.dtype if out_dtype is None else out_dtype

    # Rare, off-default path: with kernel_size == 1, padded frames only see the
    # bias and stride just subsamples time, so a wrapper-side transform matches
    # nn.Conv1d semantics exactly.
    if padding:
        x = jnp.pad(x, ((0, 0), (0, 0), (padding, padding)))
    if stride != 1:
        x = x[:, :, ::stride]

    B, Cin, T = x.shape
    assert Cin == Cin_w, (Cin, Cin_w)
    if b is None:
        b = jnp.zeros((Cout,), jnp.float32)

    x_c = x.astype(compute_dtype)         # no-op in a bf16 encoder
    w_c = w.astype(compute_dtype)
    b_c = b.astype(jnp.float32).reshape(Cout, 1)   # added to the f32 accumulator

    in_bytes = jnp.dtype(compute_dtype).itemsize
    out_bytes = jnp.dtype(out_dtype).itemsize
    capacity = _vmem_capacity_bytes()
    target_cols = block_cols if block_cols is not None else (2048 if in_bytes <= 2 else 1024)
    bB, tT, footprint = _choose_tiles(B, Cin, Cout, T, in_bytes, out_bytes,
                                      vmem_budget=capacity // 2,
                                      target_cols=target_cols)
    vmem_limit = int(min(int(0.9 * capacity),
                         max(footprint + (16 << 20), 32 << 20)))
    grid = (_cdiv(B, bB), _cdiv(T, tT))   # edge blocks are masked by Pallas

    flops = 2 * B * Cout * Cin * T
    bytes_accessed = int(x_c.size * in_bytes + w_c.size * in_bytes
                         + Cout * 4 + B * Cout * T * out_bytes)

    return pl.pallas_call(
        _pointwise_conv1d_kernel,
        out_shape=jax.ShapeDtypeStruct((B, Cout, T), out_dtype),
        grid=grid,
        in_specs=[
            # Time on lanes, channels on sublanes / MXU K.
            pl.BlockSpec((bB, Cin, tT), lambda i, j: (i, 0, j)),
            # Constant block index -> fetched once, resident across the grid.
            pl.BlockSpec((Cout, Cin), lambda i, j: (0, 0)),
            pl.BlockSpec((Cout, 1), lambda i, j: (0, 0)),
        ],
        out_specs=pl.BlockSpec((bB, Cout, tT), lambda i, j: (i, 0, j)),
        compiler_params=pltpu.CompilerParams(
            # Both axes independent -> megacore / v7x dual-TC can shard them.
            dimension_semantics=("parallel", "parallel"),
            vmem_limit_bytes=vmem_limit),
        cost_estimate=pl.CostEstimate(flops=flops, transcendentals=0,
                                      bytes_accessed=bytes_accessed),
    )(x_c, w_c, b_c)


def _reference(x, w, b, *, stride=1, padding=0,
               compute_dtype=jnp.bfloat16, out_dtype=None):
    """Plain-JAX reference matching the kernel's precision choices."""
    out_dtype = x.dtype if out_dtype is None else out_dtype
    if padding:
        x = jnp.pad(x, ((0, 0), (0, 0), (padding, padding)))
    if stride != 1:
        x = x[:, :, ::stride]
    y = jnp.einsum("oc,bct->bot", w.astype(compute_dtype), x.astype(compute_dtype),
                   preferred_element_type=jnp.float32)
    y = y + b.astype(jnp.float32)[None, :, None]
    return y.astype(out_dtype)


def _check(out, ref, tol):
    assert out.shape == ref.shape, (out.shape, ref.shape)
    o = out.astype(jnp.float32)
    r = ref.astype(jnp.float32)
    err = float(jnp.max(jnp.abs(o - r)))
    assert jnp.allclose(o, r, rtol=tol, atol=tol), err


if __name__ == "__main__":
    key = jax.random.PRNGKey(0)
    k_x, k_w, k_b = jax.random.split(key, 3)

    # --- Test A: default bf16 I/O path, lane-friendly shapes ----------------
    B, Cin, Cout, T = 2, 64, 128, 256
    x = jax.random.normal(k_x, (B, Cin, T), jnp.float32).astype(jnp.bfloat16)
    w = 0.1 * jax.random.normal(k_w, (Cout, Cin, 1), jnp.float32)   # PyTorch layout
    b = 0.1 * jax.random.normal(k_b, (Cout,), jnp.float32)

    out = jax.block_until_ready(pointwise_conv1d(x, w, b))
    ref = _reference(x, w[:, :, 0], b)
    assert out.dtype == jnp.bfloat16, out.dtype
    _check(out, ref, 2e-2)

    # --- Test B: f32 path, T not a multiple of 128 (masked edge time block) -
    B2, T2 = 2, 200
    x2 = jax.random.normal(k_x, (B2, Cin, T2), jnp.float32)
    out2 = jax.block_until_ready(
        pointwise_conv1d(x2, w, b, compute_dtype=jnp.float32, block_cols=128))
    ref2 = _reference(x2, w[:, :, 0], b, compute_dtype=jnp.float32)
    _check(out2, ref2, 2e-2)

    # --- Test C: stride/padding + batch-blocked grid (masked batch edge) ----
    B3, Cin3, Cout3, T3 = 3, 32, 64, 254
    x3 = jax.random.normal(k_x, (B3, Cin3, T3), jnp.float32).astype(jnp.bfloat16)
    w3 = 0.1 * jax.random.normal(k_w, (Cout3, Cin3), jnp.float32)
    b3 = 0.1 * jax.random.normal(k_b, (Cout3,), jnp.float32)
    out3 = jax.block_until_ready(
        pointwise_conv1d(x3, w3, b3, stride=2, padding=1, block_cols=256))
    ref3 = _reference(x3, w3, b3, stride=2, padding=1)
    _check(out3, ref3, 2e-2)

    print("KERNEL_OK")
</pallas_src>

<mosaic_0001>
module attributes {stable_mosaic.version = 11 : i64} {
  func.func @_pointwise_conv1d_kernel(%arg0: i32, %arg1: i32, %arg2: memref<2x64x256xbf16, #tpu.memory_space<vmem>>, %arg3: memref<128x64xbf16, #tpu.memory_space<vmem>>, %arg4: memref<128x1xf32, #tpu.memory_space<vmem>>, %arg5: memref<2x128x256xbf16, #tpu.memory_space<vmem>>) attributes {dimension_semantics = [#tpu.dimension_semantics<parallel>, #tpu.dimension_semantics<parallel>], iteration_bounds = array<i64: 1, 1>, scalar_prefetch = 0 : i64, scratch_operands = 0 : i64, tpu.core_type = #tpu.core_type<tc>, window_params = [{transform_indices = @transform_0, window_bounds = array<i64: 2, 64, 256>}, {pipeline_mode = #tpu.pipeline_mode<synchronous>, transform_indices = @transform_1, window_bounds = array<i64: 128, 64>}, {pipeline_mode = #tpu.pipeline_mode<synchronous>, transform_indices = @transform_2, window_bounds = array<i64: 128, 1>}, {transform_indices = @transform_3, window_bounds = array<i64: 2, 128, 256>}]} {
    %c0 = arith.constant 0 : index
    %c0_0 = arith.constant 0 : index
    %0 = vector.load %arg3[%c0, %c0_0] : memref<128x64xbf16, #tpu.memory_space<vmem>>, vector<128x64xbf16>
    %c0_1 = arith.constant 0 : index
    %c0_2 = arith.constant 0 : index
    %1 = vector.load %arg4[%c0_1, %c0_2] : memref<128x1xf32, #tpu.memory_space<vmem>>, vector<128x1xf32>
    %c0_3 = arith.constant 0 : index
    %c0_4 = arith.constant 0 : index
    %c0_5 = arith.constant 0 : index
    %2 = vector.load %arg2[%c0_3, %c0_4, %c0_5] : memref<2x64x256xbf16, #tpu.memory_space<vmem>>, vector<1x64x256xbf16>
    %3 = vector.shape_cast %2 : vector<1x64x256xbf16> to vector<64x256xbf16>
    %cst = arith.constant dense<0.000000e+00> : vector<128x256xf32>
    %4 = tpu.matmul %0, %3, %cst {dimension_numbers = #tpu.dot_dimension_numbers<[1], [0], [0], [1], [0, 0, 1, 1], [], []>} : vector<128x64xbf16>, vector<64x256xbf16>, vector<128x256xf32> -> vector<128x256xf32>
    %5 = vector.broadcast %1 : vector<128x1xf32> to vector<128x256xf32>
    %6 = arith.addf %4, %5 : vector<128x256xf32>
    %7 = arith.truncf %6 : vector<128x256xf32> to vector<128x256xbf16>
    %c0_6 = arith.constant 0 : index
    %c0_7 = arith.constant 0 : index
    %c0_8 = arith.constant 0 : index
    %8 = vector.load %arg5[%c0_6, %c0_7, %c0_8] : memref<2x128x256xbf16, #tpu.memory_space<vmem>>, vector<1x128x256xbf16>
    %9 = vector.shape_cast %8 : vector<1x128x256xbf16> to vector<128x256xbf16>
    %10 = vector.shape_cast %7 : vector<128x256xbf16> to vector<1x128x256xbf16>
    tpu.vector_store %arg5[%c0_6, %c0_7, %c0_8], %10 {strides = array<i32>} : memref<2x128x256xbf16, #tpu.memory_space<vmem>>, vector<1x128x256xbf16>,
    %c1 = arith.constant 1 : index
    %c0_9 = arith.constant 0 : index
    %c0_10 = arith.constant 0 : index
    %11 = vector.load %arg2[%c1, %c0_9, %c0_10] : memref<2x64x256xbf16, #tpu.memory_space<vmem>>, vector<1x64x256xbf16>
    %12 = vector.shape_cast %11 : vector<1x64x256xbf16> to vector<64x256xbf16>
    %cst_11 = arith.constant dense<0.000000e+00> : vector<128x256xf32>
    %13 = tpu.matmul %0, %12, %cst_11 {dimension_numbers = #tpu.dot_dimension_numbers<[1], [0], [0], [1], [0, 0, 1, 1], [], []>} : vector<128x64xbf16>, vector<64x256xbf16>, vector<128x256xf32> -> vector<128x256xf32>
    %14 = vector.broadcast %1 : vector<128x1xf32> to vector<128x256xf32>
    %15 = arith.addf %13, %14 : vector<128x256xf32>
    %16 = arith.truncf %15 : vector<128x256xf32> to vector<128x256xbf16>
    %c1_12 = arith.constant 1 : index
    %c0_13 = arith.constant 0 : index
    %c0_14 = arith.constant 0 : index
    %17 = vector.load %arg5[%c1_12, %c0_13, %c0_14] : memref<2x128x256xbf16, #tpu.memory_space<vmem>>, vector<1x128x256xbf16>
    %18 = vector.shape_cast %17 : vector<1x128x256xbf16> to vector<128x256xbf16>
    %19 = vector.shape_cast %16 : vector<128x256xbf16> to vector<1x128x256xbf16>
    tpu.vector_store %arg5[%c1_12, %c0_13, %c0_14], %19 {strides = array<i32>} : memref<2x128x256xbf16, #tpu.memory_space<vmem>>, vector<1x128x256xbf16>,
    return
  }
  func.func @transform_0(%arg0: i32, %arg1: i32) -> (i32, i32, i32) {
    %c0_i32 = arith.constant 0 : i32
    %c0_i32_0 = arith.constant 0 : i32
    return %arg0, %c0_i32, %arg1 : i32, i32, i32
  }
  func.func @transform_1(%arg0: i32, %arg1: i32) -> (i32, i32) {
    %c0_i32 = arith.constant 0 : i32
    %c0_i32_0 = arith.constant 0 : i32
    %c0_i32_1 = arith.constant 0 : i32
    return %c0_i32, %c0_i32_0 : i32, i32
  }
  func.func @transform_2(%arg0: i32, %arg1: i32) -> (i32, i32) {
    %c0_i32 = arith.constant 0 : i32
    %c0_i32_0 = arith.constant 0 : i32
    %c0_i32_1 = arith.constant 0 : i32
    return %c0_i32, %c0_i32_0 : i32, i32
  }
  func.func @transform_3(%arg0: i32, %arg1: i32) -> (i32, i32, i32) {
    %c0_i32 = arith.constant 0 : i32
    %c0_i32_0 = arith.constant 0 : i32
    return %arg0, %c0_i32, %arg1 : i32, i32, i32
  }
}

</mosaic_0001>

<bundles_post_ra>
// kernel: tpu_custom_call.1
= control target key start
LH: loop header
LB: loop body
LE: loop exit
PB: predicated region body
PF: predicated region fallthrough
CT: control target
= control target key end

     0   :  { %v931_v2 = vmov 0   ;;  %vm216_vm0 = vcmask 523264   ;;  %s1121_s0 = inlined_call_operand.vmem [shape: bf16[2,64,256], index: 0, kind: input, shape index: {}]   ;;  %s1122_s1 = inlined_call_operand.vmem [shape: bf16[128,64], index: 1, kind: input, shape index: {}]   ;;  %s1123_s2 = inlined_call_operand.vmem [shape: f32[128,1], index: 2, kind: input, shape index: {}]   ;;  %s1124_s3 = inlined_call_operand.hbm [shape: bf16[2,128,256], index: 3, kind: output, shape index: {}]  }
   0x1   :  { %v875_v0 = vld [vmem:[%s1121_s0 + $0x4] ss:$8 sps:$4 sm:$0xff]   ;;  %273 = vmatprep.mubr.bf16.mxu0 %v931_v2  ;;  %547 = vmatprep.mubr.bf16.mxu1 %v931_v2  ;;  %v879_v3 = vld [vmem:[%s1121_s0] ss:$8 sps:$4 sm:$0xff]   ;;  %v881_v5 = vld [vmem:[%s1121_s0 + $0x14] ss:$8 sps:$4 sm:$0xff]  }
   0x2   :  { %v877_v1 = vld [vmem:[%s1121_s0 + $0x44] ss:$8 sps:$4 sm:$0xff]   ;;  %241 = vmatprep.subr.bf16.mxu0 %v875_v0  ;;  %v880_v4 = vld [vmem:[%s1121_s0 + $0x40] ss:$8 sps:$4 sm:$0xff]   ;;  %873 = vset.pattern.permute.xlu0 %v931_v2  ;;  %v883_v6 = vld [vmem:[%s1121_s0 + $0x54] ss:$8 sps:$4 sm:$0xff]  }
   0x3   :  { %515 = vmatprep.subr.bf16.mxu1 %v877_v1  ;;  %874 = vset.pattern.permute.xlu1 %v931_v2  ;;  %v885_v7 = vld [vmem:[%s1121_s0 + $0x10] ss:$8 sps:$4 sm:$0xff]   ;;  %v887_v9 = vld [vmem:[%s1121_s0 + $0x24] ss:$8 sps:$4 sm:$0xff]   ;;  %v891_v11 = vld [vmem:[%s1121_s0 + $0x20] ss:$8 sps:$4 sm:$0xff]  }
   0x4   :  { %242 = vmatpush1.bf16.msra.mxu0 %v879_v3  ;;  %516 = vmatpush1.bf16.msra.mxu1 %v880_v4  ;;  %v886_v8 = vld [vmem:[%s1121_s0 + $0x50] ss:$8 sps:$4 sm:$0xff]   ;;  %v889_v10 = vld [vmem:[%s1121_s0 + $0x64] ss:$8 sps:$4 sm:$0xff]   ;;  %v892_v12 = vld [vmem:[%s1121_s0 + $0x60] ss:$8 sps:$4 sm:$0xff]  }
   0x5   :  { %243 = vmatprep.subr.bf16.mxu0 %v881_v5  ;;  %517 = vmatprep.subr.bf16.mxu1 %v883_v6  ;;  %v893_v13 = vld [vmem:[%s1121_s0 + $0x34] ss:$8 sps:$4 sm:$0xff]   ;;  %v897_v15 = vld [vmem:[%s1121_s0 + $0x30] ss:$8 sps:$4 sm:$0xff]   ;;  %v899_v17 = vld [vmem:[%s1122_s1] sm:$0xff]  }
   0x6   :  { %v895_v14 = vld [vmem:[%s1121_s0 + $0x74] ss:$8 sps:$4 sm:$0xff]   ;;  %v898_v16 = vld [vmem:[%s1121_s0 + $0x70] ss:$8 sps:$4 sm:$0xff]   ;;  %v32_v18 = vld [vmem:[%s1123_s2] sm:$0xff] }
   0x7   :  { %v34_v19 = vld [vmem:[%s1123_s2 + $0x10] sm:$0xff]  ;;  %58 = vperm.xlu0 %873, %v32_v18   ;;  %v33_v20 = vld [vmem:[%s1123_s2 + $0x8] sm:$0xff]  ;;  %v35_v21 = vld [vmem:[%s1123_s2 + $0x18] sm:$0xff] }
   0x8   :  { %244 = vmatpush1.bf16.msra.mxu0 %v885_v7  ;;  %518 = vmatpush1.bf16.msra.mxu1 %v886_v8  ;;  %v900_v22 = vld [vmem:[%s1122_s1 + $0x8] sm:$0xff]  }
   0x9   :  { %245 = vmatprep.subr.bf16.mxu0 %v887_v9  ;;  %519 = vmatprep.subr.bf16.mxu1 %v889_v10 }
   0xa   :  { %68 = vperm.xlu1 %874, %v34_v19  }
   0xc   :  { %246 = vmatpush1.bf16.msra.mxu0 %v891_v11  ;;  %520 = vmatpush1.bf16.msra.mxu1 %v892_v12 }
   0xd   :  { %247 = vmatprep.subr.bf16.mxu0 %v893_v13  ;;  %521 = vmatprep.subr.bf16.mxu1 %v895_v14 }
  0x10   :  { %248 = vmatpush1.bf16.msra.mxu0 %v897_v15  ;;  %522 = vmatpush1.bf16.msra.mxu1 %v898_v16 }
  0x13   :  { %773 = vmatmul.mubr.msk.bf16.vlgmr.msra.gmra.mrb[0].mxu0 %vm216_vm0, %v899_v17  ;;  %813 = vmatmul.mubr.msk.bf16.vlgmr.msra.gmra.mrb[0].mxu1 %vm216_vm0, %v899_v17 }
  0x14   :  { %283 = vmatprep.mubr.bf16.mxu0 %v931_v2  ;;  %557 = vmatprep.mubr.bf16.mxu1 %v931_v2 }
  0x15   :  { %8 = vsyncpa [#allocation3], 0  ;;  %63 = vperm.xlu0 %873, %v33_v20   ;;  %73 = vperm.xlu1 %874, %v35_v21   ;;  %v37_v23 = vld [vmem:[%s1123_s2 + $0x28] sm:$0xff]  ;;  %v36_v24 = vld [vmem:[%s1123_s2 + $0x20] sm:$0xff] }
  0x16   :  { %v39_v25 = vld [vmem:[%s1123_s2 + $0x38] sm:$0xff]  ;;  %v38_v26 = vld [vmem:[%s1123_s2 + $0x30] sm:$0xff]  ;;  %v41_v28 = vld [vmem:[%s1123_s2 + $0x48] sm:$0xff] }
  0x17   :  { %v901_v27 = vld [vmem:[%s1122_s1 + $0x10] sm:$0xff]   ;;  %v40_v29 = vld [vmem:[%s1123_s2 + $0x40] sm:$0xff]  ;;  %v43_v30 = vld [vmem:[%s1123_s2 + $0x58] sm:$0xff] }
  0x18   :  { %v42_v31 = vld [vmem:[%s1123_s2 + $0x50] sm:$0xff]  ;;  %v902_v32 = vld [vmem:[%s1122_s1 + $0x18] sm:$0xff]   ;;  %v45_v33 = vld [vmem:[%s1123_s2 + $0x68] sm:$0xff] }
  0x19   :  { %83 = vperm.xlu1 %874, %v37_v23   ;;  %78 = vperm.xlu0 %873, %v36_v24   ;;  %v44_v34 = vld [vmem:[%s1123_s2 + $0x60] sm:$0xff]  ;;  %v47_v35 = vld [vmem:[%s1123_s2 + $0x78] sm:$0xff]  ;;  %v46_v36 = vld [vmem:[%s1123_s2 + $0x70] sm:$0xff] }
  0x1a   :  { %v903_v37 = vld [vmem:[%s1122_s1 + $0x20] sm:$0xff]   ;;  %v904_v38 = vld [vmem:[%s1122_s1 + $0x28] sm:$0xff]   ;;  %v905_v39 = vld [vmem:[%s1122_s1 + $0x30] sm:$0xff]  }
  0x1b   :  { %774 = vmatmul.mubr.msk.bf16.gmra.mrb[4].mxu0 %vm216_vm0, %v900_v22  ;;  %814 = vmatmul.mubr.msk.bf16.gmra.mrb[4].mxu1 %vm216_vm0, %v900_v22  ;;  %v906_v40 = vld [vmem:[%s1122_s1 + $0x38] sm:$0xff]   ;;  %s932_s1 = smov [#allocation2]  }
  0x1c   :  { %293 = vmatprep.mubr.bf16.mxu0 %v931_v2  ;;  %567 = vmatprep.mubr.bf16.mxu1 %v931_v2  ;;  %s746_s8 = sshll.u32 %s932_s1, 4  ;;  %s747_s8 = int_to_ptr.vmem [resolvable:$true] %s746_s8 }
  0x1d   :  { %93 = vperm.xlu1 %874, %v39_v25   ;;  %88 = vperm.xlu0 %873, %v38_v26   ;;  %s907_s9 = scalar_lea.vmem %s747_s8, 4096  ;;  %p912_p1 = scmp.lt.s32.totalorder %s747_s8, %s747_s8 }
  0x1e   :  { %p908_p0 = scmp.ne.s32.totalorder %s747_s8, %s907_s9  ;;  %p913_p2 = scmp.lt.s32.totalorder %s907_s9, %s907_s9 }
  0x20   :  { %p914_p3 = por %p913_p2, %p912_p1 }
  0x21   :  { %103 = vperm.xlu1 %874, %v41_v28   ;;  %98 = vperm.xlu0 %873, %v40_v29  }
  0x22   :  { %p915_p4 = pnand %p914_p3, %p908_p0 }
  0x23   :  { %775 = vmatmul.mubr.msk.bf16.gmra.mrb[8].mxu0 %vm216_vm0, %v901_v27  ;;  %815 = vmatmul.mubr.msk.bf16.gmra.mrb[8].mxu1 %vm216_vm0, %v901_v27 }
  0x24   :  { %303 = vmatprep.mubr.bf16.mxu0 %v931_v2  ;;  %577 = vmatprep.mubr.bf16.mxu1 %v931_v2 }
  0x25   :  { %113 = vperm.xlu1 %874, %v43_v30   ;;  %108 = vperm.xlu0 %873, %v42_v31  }
  0x29   :  { %123 = vperm.xlu1 %874, %v45_v33   ;;  %118 = vperm.xlu0 %873, %v44_v34  }
  0x2b   :  { %776 = vmatmul.mubr.msk.bf16.gmra.mrb[12].mxu0 %vm216_vm0, %v902_v32  ;;  %816 = vmatmul.mubr.msk.bf16.gmra.mrb[12].mxu1 %vm216_vm0, %v902_v32 }
  0x2c   :  { %313 = vmatprep.mubr.bf16.mxu0 %v931_v2  ;;  %587 = vmatprep.mubr.bf16.mxu1 %v931_v2 }
  0x2d   :  { %133 = vperm.xlu1 %874, %v47_v35   ;;  %128 = vperm.xlu0 %873, %v46_v36  }
  0x33   :  { %777 = vmatmul.mubr.msk.bf16.gmra.mrb[16].mxu0 %vm216_vm0, %v903_v37  ;;  %817 = vmatmul.mubr.msk.bf16.gmra.mrb[16].mxu1 %vm216_vm0, %v903_v37 }
  0x34   :  { %323 = vmatprep.mubr.bf16.mxu0 %v931_v2  ;;  %597 = vmatprep.mubr.bf16.mxu1 %v931_v2 }
  0x3b   :  { %778 = vmatmul.mubr.msk.bf16.gmra.mrb[20].mxu0 %vm216_vm0, %v904_v38  ;;  %818 = vmatmul.mubr.msk.bf16.gmra.mrb[20].mxu1 %vm216_vm0, %v904_v38 }
  0x3c   :  { %333 = vmatprep.mubr.bf16.mxu0 %v931_v2  ;;  %607 = vmatprep.mubr.bf16.mxu1 %v931_v2 }
  0x43   :  { %779 = vmatmul.mubr.msk.bf16.gmra.mrb[24].mxu0 %vm216_vm0, %v905_v39  ;;  %819 = vmatmul.mubr.msk.bf16.gmra.mrb[24].mxu1 %vm216_vm0, %v905_v39 }
  0x44   :  { %343 = vmatprep.mubr.bf16.mxu0 %v931_v2  ;;  %617 = vmatprep.mubr.bf16.mxu1 %v931_v2 }
  0x4b   :  { %780 = vmatmul.mubr.msk.bf16.gmra.mrb[28].mxu0 %vm216_vm0, %v906_v40  ;;  %820 = vmatmul.mubr.msk.bf16.gmra.mrb[28].mxu1 %vm216_vm0, %v906_v40 }
  0x86   :  { %v59_v41 = vpop.permute.xlu0 %58 }
  0x89   :  { %v69_v43 = vpop.permute.xlu1 %68 }
  0x94   :  { %v64_v42 = vpop.permute.xlu0 %63  ;;  %v74_v0 = vpop.permute.xlu1 %73 }
  0x98   :  { %v84_v21 = vpop.permute.xlu1 %83  ;;  %v79_v22 = vpop.permute.xlu0 %78 }
  0xe6   :  { %v275_v44 = vpop.f32.mrb[0].mxu0  ;;  %v549_v45 = vpop.f32.mrb[0].mxu1 }
  0xe7   :  { %v276_v46 = vadd.f32 %v275_v44, %v59_v41  ;;  %v550_v47 = vadd.f32 %v549_v45, %v59_v41  ;;  %v277_v48 = vpop.f32.mrb[1].mxu0  ;;  %v551_v49 = vpop.f32.mrb[1].mxu1 }
  0xe8   :  { %v278_v50 = vadd.f32 %v277_v48, %v59_v41  ;;  %v552_v51 = vadd.f32 %v551_v49, %v59_v41  ;;  %v279_v52 = vpop.f32.mrb[2].mxu0  ;;  %v553_v53 = vpop.f32.mrb[2].mxu1 }
  0xe9   :  { %v280_v54 = vadd.f32 %v279_v52, %v64_v42  ;;  %v554_v55 = vadd.f32 %v553_v53, %v64_v42  ;;  %v281_v56 = vpop.f32.mrb[3].mxu0  ;;  %v555_v57 = vpop.f32.mrb[3].mxu1 }
  0xea   :  { %v837_v58 = vpack.c.bf16 %v278_v50, %v276_v46  ;;  %v853_v59 = vpack.c.bf16 %v552_v51, %v550_v47  ;;  %v282_v60 = vadd.f32 %v281_v56, %v64_v42  ;;  %v556_v61 = vadd.f32 %v555_v57, %v64_v42  ;;  %v89_v44 = vpop.permute.xlu0 %88 }
  0xec   :  { %450 = vst [vmem:[#allocation2] sm:$0xff] %v837_v58  ;;  %725 = vst [vmem:[#allocation2 + $0x80] sm:$0xff] %v853_v59  ;;  %v838_v62 = vpack.c.bf16 %v282_v60, %v280_v54  ;;  %v854_v63 = vpack.c.bf16 %v556_v61, %v554_v55 }
  0xee   :  { %451 = vst [vmem:[#allocation2 + $0x8] sm:$0xff] %v838_v62  ;;  %726 = vst [vmem:[#allocation2 + $0x88] sm:$0xff] %v854_v63  ;;  %v285_v1 = vpop.f32.mrb[4].mxu0  ;;  %v559_v2 = vpop.f32.mrb[4].mxu1 }
  0xef   :  { %v286_v3 = vadd.f32 %v285_v1, %v69_v43  ;;  %v560_v4 = vadd.f32 %v559_v2, %v69_v43  ;;  %v287_v5 = vpop.f32.mrb[5].mxu0  ;;  %v561_v6 = vpop.f32.mrb[5].mxu1 }
  0xf0   :  { %v288_v7 = vadd.f32 %v287_v5, %v69_v43  ;;  %v562_v8 = vadd.f32 %v561_v6, %v69_v43  ;;  %v289_v9 = vpop.f32.mrb[6].mxu0  ;;  %v563_v10 = vpop.f32.mrb[6].mxu1 }
  0xf1   :  { %v290_v11 = vadd.f32 %v289_v9, %v74_v0  ;;  %v564_v12 = vadd.f32 %v563_v10, %v74_v0  ;;  %v291_v13 = vpop.f32.mrb[7].mxu0  ;;  %v565_v14 = vpop.f32.mrb[7].mxu1 }
  0xf2   :  { %v839_v15 = vpack.c.bf16 %v288_v7, %v286_v3  ;;  %v855_v16 = vpack.c.bf16 %v562_v8, %v560_v4  ;;  %v292_v17 = vadd.f32 %v291_v13, %v74_v0  ;;  %v566_v18 = vadd.f32 %v565_v14, %v74_v0  ;;  %v94_v43 = vpop.permute.xlu1 %93  ;;  %v99_v2 = vpop.permute.xlu0 %98 }
  0xf4   :  { %452 = vst [vmem:[#allocation2 + $0x10] sm:$0xff] %v839_v15  ;;  %727 = vst [vmem:[#allocation2 + $0x90] sm:$0xff] %v855_v16  ;;  %v840_v19 = vpack.c.bf16 %v292_v17, %v290_v11  ;;  %v856_v20 = vpack.c.bf16 %v566_v18, %v564_v12 }
  0xf6   :  { %453 = vst [vmem:[#allocation2 + $0x18] sm:$0xff] %v840_v19  ;;  %728 = vst [vmem:[#allocation2 + $0x98] sm:$0xff] %v856_v20  ;;  %v295_v23 = vpop.f32.mrb[8].mxu0  ;;  %v569_v24 = vpop.f32.mrb[8].mxu1 }
  0xf7   :  { %v296_v25 = vadd.f32 %v295_v23, %v79_v22  ;;  %v570_v26 = vadd.f32 %v569_v24, %v79_v22  ;;  %v297_v27 = vpop.f32.mrb[9].mxu0  ;;  %v571_v28 = vpop.f32.mrb[9].mxu1 }
  0xf8   :  { %v298_v29 = vadd.f32 %v297_v27, %v79_v22  ;;  %v572_v30 = vadd.f32 %v571_v28, %v79_v22  ;;  %v299_v31 = vpop.f32.mrb[10].mxu0  ;;  %v573_v32 = vpop.f32.mrb[10].mxu1 }
  0xf9   :  { %v300_v33 = vadd.f32 %v299_v31, %v84_v21  ;;  %v574_v34 = vadd.f32 %v573_v32, %v84_v21  ;;  %v301_v35 = vpop.f32.mrb[11].mxu0  ;;  %v575_v36 = vpop.f32.mrb[11].mxu1 }
  0xfa   :  { %v841_v37 = vpack.c.bf16 %v298_v29, %v296_v25  ;;  %v857_v38 = vpack.c.bf16 %v572_v30, %v570_v26  ;;  %v302_v39 = vadd.f32 %v301_v35, %v84_v21  ;;  %v576_v40 = vadd.f32 %v575_v36, %v84_v21  ;;  %v104_v1 = vpop.permute.xlu1 %103  ;;  %v109_v24 = vpop.permute.xlu0 %108 }
  0xfc   :  { %454 = vst [vmem:[#allocation2 + $0x20] sm:$0xff] %v841_v37  ;;  %729 = vst [vmem:[#allocation2 + $0xa0] sm:$0xff] %v857_v38  ;;  %v842_v41 = vpack.c.bf16 %v302_v39, %v300_v33  ;;  %v858_v42 = vpack.c.bf16 %v576_v40, %v574_v34 }
  0xfe   :  { %455 = vst [vmem:[#allocation2 + $0x28] sm:$0xff] %v842_v41  ;;  %730 = vst [vmem:[#allocation2 + $0xa8] sm:$0xff] %v858_v42  ;;  %v305_v45 = vpop.f32.mrb[12].mxu0  ;;  %v579_v46 = vpop.f32.mrb[12].mxu1 }
  0xff   :  { %v306_v47 = vadd.f32 %v305_v45, %v89_v44  ;;  %v580_v48 = vadd.f32 %v579_v46, %v89_v44  ;;  %v307_v49 = vpop.f32.mrb[13].mxu0  ;;  %v581_v50 = vpop.f32.mrb[13].mxu1 }
 0x100   :  { %v308_v51 = vadd.f32 %v307_v49, %v89_v44  ;;  %v582_v52 = vadd.f32 %v581_v50, %v89_v44  ;;  %v309_v53 = vpop.f32.mrb[14].mxu0  ;;  %v583_v54 = vpop.f32.mrb[14].mxu1 }
 0x101   :  { %v310_v55 = vadd.f32 %v309_v53, %v94_v43  ;;  %v584_v56 = vadd.f32 %v583_v54, %v94_v43  ;;  %v311_v57 = vpop.f32.mrb[15].mxu0  ;;  %v585_v58 = vpop.f32.mrb[15].mxu1 }
 0x102   :  { %v843_v59 = vpack.c.bf16 %v308_v51, %v306_v47  ;;  %v859_v60 = vpack.c.bf16 %v582_v52, %v580_v48  ;;  %v312_v61 = vadd.f32 %v311_v57, %v94_v43  ;;  %v586_v62 = vadd.f32 %v585_v58, %v94_v43  ;;  %v114_v23 = vpop.permute.xlu1 %113  ;;  %v119_v46 = vpop.permute.xlu0 %118 }
 0x104   :  { %456 = vst [vmem:[#allocation2 + $0x30] sm:$0xff] %v843_v59  ;;  %731 = vst [vmem:[#allocation2 + $0xb0] sm:$0xff] %v859_v60  ;;  %v844_v63 = vpack.c.bf16 %v312_v61, %v310_v55  ;;  %v860_v0 = vpack.c.bf16 %v586_v62, %v584_v56 }
 0x106   :  { %457 = vst [vmem:[#allocation2 + $0x38] sm:$0xff] %v844_v63  ;;  %732 = vst [vmem:[#allocation2 + $0xb8] sm:$0xff] %v860_v0  ;;  %v315_v3 = vpop.f32.mrb[16].mxu0  ;;  %v589_v4 = vpop.f32.mrb[16].mxu1 }
 0x107   :  { %v316_v5 = vadd.f32 %v315_v3, %v99_v2  ;;  %v590_v6 = vadd.f32 %v589_v4, %v99_v2  ;;  %v317_v7 = vpop.f32.mrb[17].mxu0  ;;  %v591_v8 = vpop.f32.mrb[17].mxu1 }
 0x108   :  { %v318_v9 = vadd.f32 %v317_v7, %v99_v2  ;;  %v592_v10 = vadd.f32 %v591_v8, %v99_v2  ;;  %v319_v11 = vpop.f32.mrb[18].mxu0  ;;  %v593_v12 = vpop.f32.mrb[18].mxu1 }
 0x109   :  { %v320_v13 = vadd.f32 %v319_v11, %v104_v1  ;;  %v594_v14 = vadd.f32 %v593_v12, %v104_v1  ;;  %v321_v15 = vpop.f32.mrb[19].mxu0  ;;  %v595_v16 = vpop.f32.mrb[19].mxu1 }
 0x10a   :  { %v845_v17 = vpack.c.bf16 %v318_v9, %v316_v5  ;;  %v861_v18 = vpack.c.bf16 %v592_v10, %v590_v6  ;;  %v322_v19 = vadd.f32 %v321_v15, %v104_v1  ;;  %v596_v20 = vadd.f32 %v595_v16, %v104_v1  ;;  %v124_v45 = vpop.permute.xlu1 %123  ;;  %v129_v4 = vpop.permute.xlu0 %128 }
 0x10c   :  { %458 = vst [vmem:[#allocation2 + $0x40] sm:$0xff] %v845_v17  ;;  %733 = vst [vmem:[#allocation2 + $0xc0] sm:$0xff] %v861_v18  ;;  %v846_v21 = vpack.c.bf16 %v322_v19, %v320_v13  ;;  %v862_v22 = vpack.c.bf16 %v596_v20, %v594_v14 }
 0x10e   :  { %459 = vst [vmem:[#allocation2 + $0x48] sm:$0xff] %v846_v21  ;;  %734 = vst [vmem:[#allocation2 + $0xc8] sm:$0xff] %v862_v22  ;;  %v325_v25 = vpop.f32.mrb[20].mxu0  ;;  %v599_v26 = vpop.f32.mrb[20].mxu1 }
 0x10f   :  { %v326_v27 = vadd.f32 %v325_v25, %v109_v24  ;;  %v600_v28 = vadd.f32 %v599_v26, %v109_v24  ;;  %v327_v29 = vpop.f32.mrb[21].mxu0  ;;  %v601_v30 = vpop.f32.mrb[21].mxu1 }
 0x110   :  { %v328_v31 = vadd.f32 %v327_v29, %v109_v24  ;;  %v602_v32 = vadd.f32 %v601_v30, %v109_v24  ;;  %v329_v33 = vpop.f32.mrb[22].mxu0  ;;  %v603_v34 = vpop.f32.mrb[22].mxu1 }
 0x111   :  { %v330_v35 = vadd.f32 %v329_v33, %v114_v23  ;;  %v604_v36 = vadd.f32 %v603_v34, %v114_v23  ;;  %v331_v37 = vpop.f32.mrb[23].mxu0  ;;  %v605_v38 = vpop.f32.mrb[23].mxu1 }
 0x112   :  { %v847_v39 = vpack.c.bf16 %v328_v31, %v326_v27  ;;  %v863_v40 = vpack.c.bf16 %v602_v32, %v600_v28  ;;  %v332_v41 = vadd.f32 %v331_v37, %v114_v23  ;;  %v606_v42 = vadd.f32 %v605_v38, %v114_v23  ;;  %v134_v3 = vpop.permute.xlu1 %133 }
 0x114   :  { %460 = vst [vmem:[#allocation2 + $0x50] sm:$0xff] %v847_v39  ;;  %735 = vst [vmem:[#allocation2 + $0xd0] sm:$0xff] %v863_v40  ;;  %v848_v43 = vpack.c.bf16 %v332_v41, %v330_v35  ;;  %v864_v44 = vpack.c.bf16 %v606_v42, %v604_v36 }
 0x116   :  { %461 = vst [vmem:[#allocation2 + $0x58] sm:$0xff] %v848_v43  ;;  %736 = vst [vmem:[#allocation2 + $0xd8] sm:$0xff] %v864_v44  ;;  %v335_v47 = vpop.f32.mrb[24].mxu0  ;;  %v609_v48 = vpop.f32.mrb[24].mxu1 }
 0x117   :  { %v336_v49 = vadd.f32 %v335_v47, %v119_v46  ;;  %v610_v50 = vadd.f32 %v609_v48, %v119_v46  ;;  %v337_v51 = vpop.f32.mrb[25].mxu0  ;;  %v611_v52 = vpop.f32.mrb[25].mxu1 }
 0x118   :  { %v338_v53 = vadd.f32 %v337_v51, %v119_v46  ;;  %v612_v54 = vadd.f32 %v611_v52, %v119_v46  ;;  %v339_v55 = vpop.f32.mrb[26].mxu0  ;;  %v613_v56 = vpop.f32.mrb[26].mxu1 }
 0x119   :  { %v340_v57 = vadd.f32 %v339_v55, %v124_v45  ;;  %v614_v58 = vadd.f32 %v613_v56, %v124_v45  ;;  %v341_v59 = vpop.f32.mrb[27].mxu0  ;;  %v615_v60 = vpop.f32.mrb[27].mxu1 }
 0x11a   :  { %v849_v61 = vpack.c.bf16 %v338_v53, %v336_v49  ;;  %v865_v62 = vpack.c.bf16 %v612_v54, %v610_v50  ;;  %v342_v63 = vadd.f32 %v341_v59, %v124_v45  ;;  %v616_v0 = vadd.f32 %v615_v60, %v124_v45 }
 0x11c   :  { %462 = vst [vmem:[#allocation2 + $0x60] sm:$0xff] %v849_v61  ;;  %737 = vst [vmem:[#allocation2 + $0xe0] sm:$0xff] %v865_v62  ;;  %v850_v1 = vpack.c.bf16 %v342_v63, %v340_v57  ;;  %v866_v2 = vpack.c.bf16 %v616_v0, %v614_v58 }
 0x11e   :  { %463 = vst [vmem:[#allocation2 + $0x68] sm:$0xff] %v850_v1  ;;  %738 = vst [vmem:[#allocation2 + $0xe8] sm:$0xff] %v866_v2  ;;  %v345_v5 = vpop.f32.mrb[28].mxu0  ;;  %v619_v6 = vpop.f32.mrb[28].mxu1 }
 0x11f   :  { %v346_v7 = vadd.f32 %v345_v5, %v129_v4  ;;  %v620_v8 = vadd.f32 %v619_v6, %v129_v4  ;;  %v347_v9 = vpop.f32.mrb[29].mxu0  ;;  %v621_v10 = vpop.f32.mrb[29].mxu1 }
 0x120   :  { %v348_v11 = vadd.f32 %v347_v9, %v129_v4  ;;  %v622_v12 = vadd.f32 %v621_v10, %v129_v4  ;;  %v349_v13 = vpop.f32.mrb[30].mxu0  ;;  %v623_v14 = vpop.f32.mrb[30].mxu1 }
 0x121   :  { %v350_v15 = vadd.f32 %v349_v13, %v134_v3  ;;  %v624_v16 = vadd.f32 %v623_v14, %v134_v3  ;;  %v351_v17 = vpop.f32.mrb[31].mxu0  ;;  %v625_v18 = vpop.f32.mrb[31].mxu1 }
 0x122   :  { %v851_v19 = vpack.c.bf16 %v348_v11, %v346_v7  ;;  %v867_v20 = vpack.c.bf16 %v622_v12, %v620_v8  ;;  %v352_v21 = vadd.f32 %v351_v17, %v134_v3  ;;  %v626_v22 = vadd.f32 %v625_v18, %v134_v3 }
 0x124   :  { %464 = vst [vmem:[#allocation2 + $0x70] sm:$0xff] %v851_v19  ;;  %739 = vst [vmem:[#allocation2 + $0xf0] sm:$0xff] %v867_v20  ;;  %v852_v23 = vpack.c.bf16 %v352_v21, %v350_v15  ;;  %v868_v24 = vpack.c.bf16 %v626_v22, %v624_v16 }
 0x126   :  { %465 = vst [vmem:[#allocation2 + $0x78] sm:$0xff] %v852_v23  ;;  %740 = vst [vmem:[#allocation2 + $0xf8] sm:$0xff] %v868_v24 }
 0x127   :  { %918 = shalt.err (!%p915_p4)
}
 0x128   :  { %s919_s12 = scalar_lea.hbm %s1124_s3, 4096 }
 0x129   :  { %p920_p5 = scmp.ne.s32.totalorder %s1124_s3, %s919_s12  ;;  %p923_p6 = scmp.lt.u32.totalorder %s919_s12, %s1124_s3 }
 0x12b   :  { %p925_p7 = pnand %p923_p6, %p920_p5 }
 0x12d   :  { %928 = shalt.err (!%p925_p7)
}
 0x12e   :  { %s933_s17 = smov 128   ;;  %s934_s18 = smov 8  }
 0x12f   :  { %752 = dma.vmem_to_hbm [thread:$0]  %s747_s8, 4096, %s1124_s3, [#allocation3], %s933_s17, %s933_s17, %s934_s18  }
 0x130   :  { %929 = dma.done.wait [#allocation3], 4096  }
 0x131   :  { %930 = vsyncadd [#allocation3], 4294963200 }
 0x132   :  { %756 = vsyncpa [#allocation3], 1 }

</bundles_post_ra>
